<compile_context>
chip_gen: v5e
topology: v5e:2x2
jax: 0.10.0
libtpu: 0.0.40
codegen_flags: <defaults>
</compile_context>

<pallas_src>
import functools

import jax
import jax.numpy as jnp
import numpy as np
from jax.experimental import pallas as pl
from jax.experimental.pallas import tpu as pltpu

K = 5        # kernel size
STRIDE = 2
PAD = 2
OUTPAD = 1
EPS = 1e-5   # torch.nn.BatchNorm2d default eps


def _round_up(x, m):
    return -(-x // m) * m


def _cdiv(a, b):
    return -(-a // b)


# ---------------------------------------------------------------------------
# Kernel 1a (BN path): one deep matmul per tile + f32 partial BN statistics.
# The conv intermediate is written back as bf16 (stats reduced in f32 first).
# ---------------------------------------------------------------------------
def _conv_stats_kernel(w_ref, p_ref, y_ref, ssum_ref, ssq_ref):
    # w_ref: (c4p, ckkp) bf16   -- resident across the grid (constant index_map)
    # p_ref: (ckkp, TS)  bf16   -- im2col patch tile (lane-dense)
    # y_ref: (c4p, TS)   bf16   -- conv output tile (lane-dense, downcast)
    # ssum_ref/ssq_ref: (1, c4p, 1) f32 -- per-tile BN partial sums
    y = jnp.dot(w_ref[...], p_ref[...], preferred_element_type=jnp.float32)
    ssum_ref[0, :, :] = jnp.sum(y, axis=1, keepdims=True)
    ssq_ref[0, :, :] = jnp.sum(y * y, axis=1, keepdims=True)
    y_ref[...] = y.astype(y_ref.dtype)


# ---------------------------------------------------------------------------
# Kernel 1b (no-BN path): conv + activation fused in one pass; no stats, no
# second kernel, f32 output.
# ---------------------------------------------------------------------------
def _conv_act_kernel(w_ref, p_ref, o_ref, *, activ):
    y = jnp.dot(w_ref[...], p_ref[...], preferred_element_type=jnp.float32)
    if activ == 'relu':
        y = jnp.maximum(y, 0.0)
    elif activ == 'tanh':
        y = jnp.tanh(y)
    o_ref[...] = y


# ---------------------------------------------------------------------------
# Kernel 2 (BN path): per-channel scale/shift + activation; reads the bf16
# intermediate, all math in f32, lane-dense tiles (re-tiled wider than kernel 1).
# ---------------------------------------------------------------------------
def _bn_act_kernel(scale_ref, shift_ref, y_ref, o_ref, *, activ):
    y = y_ref[...].astype(jnp.float32) * scale_ref[...] + shift_ref[...]
    if activ == 'relu':
        y = jnp.maximum(y, 0.0)
    elif activ == 'tanh':
        y = jnp.tanh(y)
    o_ref[...] = y


def _build_subpixel_weight(w_pt, c4_pad, ckk_pad):
    """(Cin, Cout, 5, 5) ConvTranspose2d weight -> zero-padded (c4_pad, ckk_pad)
    sub-pixel 3x3-conv weight.  Row = (py*2+px)*Cout + co, col = (dy*3+dx)*Cin + ci,
    tap (kh, kw) = (py+4-2*dy, px+4-2*dx), zero where the tap falls outside 0..4."""
    cin, cout = w_pt.shape[0], w_pt.shape[1]
    w_pad = jnp.pad(w_pt, ((0, 0), (0, 0), (0, 1), (0, 1)))      # index 5 reads 0
    par = jnp.arange(2)[:, None]                                  # output parity
    off = jnp.arange(3)[None, :]                                  # dy / dx
    tap = par + 4 - 2 * off                                       # (2,3) in 0..5
    w6 = w_pad[:, :, tap][:, :, :, :, tap]        # (ci, co, py, dy, px, dx)
    w6 = jnp.transpose(w6, (2, 4, 1, 3, 5, 0))    # (py, px, co, dy, dx, ci)
    w2 = w6.reshape(4 * cout, 9 * cin)
    return jnp.pad(w2, ((0, c4_pad - 4 * cout), (0, ckk_pad - 9 * cin)))


def _build_patches(x_nchw):
    """NCHW input -> lane-dense im2col slab (9*Cin, N*H*W) for the 3x3 conv
    (halo of 1); columns are flattened (n, i, j).  Built in the input dtype
    (bf16) end-to-end -- no f32 blow-up."""
    n, cin, h, w = x_nchw.shape
    xc = jnp.transpose(x_nchw, (1, 0, 2, 3))                      # (Cin,N,H,W)
    xp = jnp.pad(xc, ((0, 0), (0, 0), (1, 1), (1, 1)))
    rows = [xp[:, :, dy:dy + h, dx:dx + w]
            for dy in range(3) for dx in range(3)]                # (Cin,N,H,W)
    p = jnp.stack(rows, axis=0)                                   # (9,Cin,N,H,W)
    # TODO(synk): longer term, do im2col in-kernel (tile over (n, image-rows) with
    # a 1-row halo) so this slab never hits HBM at all.
    return p.reshape(9 * cin, n * h * w)


@functools.partial(jax.jit, static_argnames=('activ', 'batchnorm', 'tile_s',
                                             'single_buffer_weight'))
def fractionally_strided_conv_block(x_nchw, w_pt, gamma, beta, *,
                                    activ='relu', batchnorm=True, tile_s=512,
                                    single_buffer_weight=True):
    """x_nchw: (N, Cin, H, W); w_pt: (Cin, Cout, 5, 5) = ConvTranspose2d.weight.
    Returns (N, Cout, 2H, 2W) float32.  tile_s: lane tile of the matmul kernel
    (~256 recommended on v7x at large channel counts, up to 1024 on v5e/v6e)."""
    n, cin, h, w = x_nchw.shape
    cout = w_pt.shape[1]
    ho, wo = 2 * h, 2 * w
    s = n * h * w
    c4, ckk = 4 * cout, 9 * cin
    c4p = _round_up(c4, 8)            # matmul-row / sublane alignment
    ckkp = _round_up(ckk, 16)         # bf16 sublane pack of the contraction dim

    # ---- wrapper glue: bf16 end-to-end matmul operands (layout only) ----
    w2 = _build_subpixel_weight(w_pt.astype(jnp.float32), c4p, ckkp
                                ).astype(jnp.bfloat16)
    patches = _build_patches(x_nchw.astype(jnp.bfloat16))

    # Lane tile of the matmul kernel; keep the parallel grid axis even when it is
    # multi-tile so v7x megacore splits it cleanly across both TensorCores.
    ts = max(128, min(int(tile_s), _round_up(s, 128)))
    num_tiles = _cdiv(s, ts)
    if num_tiles > 1 and num_tiles % 2 == 1:
        ts = max(128, _round_up(_cdiv(s, num_tiles + 1), 128))
        num_tiles = _cdiv(s, ts)
    s_pad = num_tiles * ts
    # Zero padding: extra contraction rows are zero in both operands (no effect on
    # the matmul) and zero tail columns contribute 0 to sum/sum-of-squares, so BN
    # statistics (count = n*ho*wo real samples) stay exact.
    patches = jnp.pad(patches, ((0, ckkp - ckk), (0, s_pad - s)))

    if single_buffer_weight:
        # Constant index_map -> no double buffering needed; saves c4p*ckkp*2 B VMEM
        # (matters at production channel counts on v5e's 16 MiB scoped default and
        # v7x's 64 MiB physical VMEM).
        w_spec = pl.BlockSpec((c4p, ckkp), lambda t: (0, 0),
                              pipeline_mode=pl.Buffered(1))
        w_bufs = 1
    else:
        w_spec = pl.BlockSpec((c4p, ckkp), lambda t: (0, 0))
        w_bufs = 2

    # Explicit VMEM budget from the actual tile sizes (+headroom), capped at the
    # smallest physical VMEM across generations (v7x: 64 MiB).
    y_bytes = 2 if batchnorm else 4
    vmem1 = (w_bufs * c4p * ckkp * 2 + 2 * ckkp * ts * 2
             + 2 * c4p * ts * y_bytes + 4 * c4p * 4)
    vmem1 = int(min(64 << 20, max(16 << 20, 2 * vmem1 + (4 << 20))))

    if batchnorm:
        # ---- kernel 1a: conv + partial BN statistics (single pass, bf16 out) ----
        y, psum, psq = pl.pallas_call(
            _conv_stats_kernel,
            grid=(num_tiles,),
            in_specs=[w_spec,
                      pl.BlockSpec((ckkp, ts), lambda t: (0, t))],
            out_specs=[pl.BlockSpec((c4p, ts), lambda t: (0, t)),
                       pl.BlockSpec((1, c4p, 1), lambda t: (t, 0, 0)),
                       pl.BlockSpec((1, c4p, 1), lambda t: (t, 0, 0))],
            out_shape=(jax.ShapeDtypeStruct((c4p, s_pad), jnp.bfloat16),
                       jax.ShapeDtypeStruct((num_tiles, c4p, 1), jnp.float32),
                       jax.ShapeDtypeStruct((num_tiles, c4p, 1), jnp.float32)),
            compiler_params=pltpu.CompilerParams(
                dimension_semantics=("parallel",), vmem_limit_bytes=vmem1),
        )(w2, patches)

        # ---- tiny XLA combine: per-channel scale/shift from partial sums ----
        count = jnp.float32(n * ho * wo)
        sums = jnp.sum(psum[..., 0], axis=0)[:c4].reshape(4, cout).sum(axis=0)
        sqs = jnp.sum(psq[..., 0], axis=0)[:c4].reshape(4, cout).sum(axis=0)
        mean = sums / count
        var = jnp.maximum(sqs / count - mean * mean, 0.0)   # train-mode biased var
        inv = jax.lax.rsqrt(var + EPS)
        scale_c = gamma.astype(jnp.float32) * inv
        shift_c = beta.astype(jnp.float32) - mean * scale_c
        scale_row = jnp.pad(jnp.tile(scale_c, 4), (0, c4p - c4)).reshape(c4p, 1)
        shift_row = jnp.pad(jnp.tile(shift_c, 4), (0, c4p - c4)).reshape(c4p, 1)

        # ---- kernel 2: normalize + affine + activation, re-tiled wider ----
        kfac = 1
        for d in range(min(num_tiles, max(1, 2048 // ts)), 0, -1):
            if num_tiles % d == 0:
                kfac = d
                break
        ts2 = ts * kfac
        grid2 = num_tiles // kfac
        vmem2 = 2 * c4p * ts2 * (2 + 4) + 4 * c4p * 4
        vmem2 = int(min(64 << 20, max(16 << 20, 2 * vmem2 + (4 << 20))))
        y_out = pl.pallas_call(
            functools.partial(_bn_act_kernel, activ=activ),
            grid=(grid2,),
            in_specs=[pl.BlockSpec((c4p, 1), lambda t: (0, 0)),
                      pl.BlockSpec((c4p, 1), lambda t: (0, 0)),
                      pl.BlockSpec((c4p, ts2), lambda t: (0, t))],
            out_specs=pl.BlockSpec((c4p, ts2), lambda t: (0, t)),
            out_shape=jax.ShapeDtypeStruct((c4p, s_pad), jnp.float32),
            compiler_params=pltpu.CompilerParams(
                dimension_semantics=("parallel",), vmem_limit_bytes=vmem2),
        )(scale_row, shift_row, y)
    else:
        # ---- no-BN path: single fused conv+activation kernel, no extra pass ----
        y_out = pl.pallas_call(
            functools.partial(_conv_act_kernel, activ=activ),
            grid=(num_tiles,),
            in_specs=[w_spec,
                      pl.BlockSpec((ckkp, ts), lambda t: (0, t))],
            out_specs=pl.BlockSpec((c4p, ts), lambda t: (0, t)),
            out_shape=jax.ShapeDtypeStruct((c4p, s_pad), jnp.float32),
            compiler_params=pltpu.CompilerParams(
                dimension_semantics=("parallel",), vmem_limit_bytes=vmem1),
        )(w2, patches)

    # ---- pixel shuffle back to PyTorch NCHW (one XLA layout pass) ----
    # TODO(synk): the (j, px) lane interleave could be done in-kernel on the idle
    # XLU so this transpose never touches the minor dim; kept in XLA for now.
    y6 = y_out[:c4, :s].reshape(2, 2, cout, n, h, w)       # (py, px, co, n, i, j)
    out = jnp.transpose(y6, (3, 2, 4, 0, 5, 1))            # (n, co, i, py, j, px)
    return out.reshape(n, cout, ho, wo)


def _reference(x, w_pt, gamma, beta, activ, batchnorm):
    """Pure-JAX reference implementing ConvTranspose2d directly (scatter form)."""
    N, Cin, H, W = x.shape
    Cout = w_pt.shape[1]
    Ho = (H - 1) * STRIDE - 2 * PAD + K + OUTPAD
    Wo = (W - 1) * STRIDE - 2 * PAD + K + OUTPAD
    full = jnp.zeros((N, Cout, (H - 1) * STRIDE + K, (W - 1) * STRIDE + K),
                     jnp.float32)
    for kh in range(K):
        for kw in range(K):
            contrib = jnp.einsum('ncij,cd->ndij', x, w_pt[:, :, kh, kw])
            full = full.at[:, :,
                           kh:kh + (H - 1) * STRIDE + 1:STRIDE,
                           kw:kw + (W - 1) * STRIDE + 1:STRIDE].add(contrib)
    y = full[:, :, PAD:PAD + Ho, PAD:PAD + Wo]
    if batchnorm:
        mean = y.mean(axis=(0, 2, 3), keepdims=True)
        var = ((y - mean) ** 2).mean(axis=(0, 2, 3), keepdims=True)
        y = (y - mean) / jnp.sqrt(var + EPS)
        y = y * gamma.reshape(1, Cout, 1, 1) + beta.reshape(1, Cout, 1, 1)
    if activ == 'relu':
        y = jnp.maximum(y, 0.0)
    elif activ == 'tanh':
        y = jnp.tanh(y)
    return y


if __name__ == "__main__":
    key = jax.random.PRNGKey(0)
    k1, k2, k3, k4 = jax.random.split(key, 4)

    N, Cin, Cout, H, W = 2, 4, 8, 16, 16
    x = jax.random.normal(k1, (N, Cin, H, W), jnp.float32)
    # ConvTranspose2d weight shape: (in_channels, out_channels, kH, kW)
    w = 0.1 * jax.random.normal(k2, (Cin, Cout, K, K), jnp.float32)
    gamma = 1.0 + 0.1 * jax.random.normal(k3, (Cout,), jnp.float32)
    beta = 0.1 * jax.random.normal(k4, (Cout,), jnp.float32)
    # TODO(synk): BatchNorm2d running_mean/running_var buffer updates are stateful
    # training bookkeeping and are not modeled; normalization uses batch statistics
    # exactly as in PyTorch train-mode forward.

    # relu + batchnorm, multi-tile (even) grid.  Prefer the single-buffered
    # resident-weight spec; fall back transparently if this jax/Mosaic build does
    # not accept pl.Buffered(1) on the top-level pipeline.
    def run_bn(sb):
        return jax.block_until_ready(
            fractionally_strided_conv_block(x, w, gamma, beta, activ='relu',
                                            batchnorm=True, tile_s=256,
                                            single_buffer_weight=sb))

    try:
        out = run_bn(True)
        sb = True
    except Exception:
        out = run_bn(False)
        sb = False

    ref = _reference(x, w, gamma, beta, 'relu', True)
    assert out.shape == (N, Cout, 2 * H, 2 * W), out.shape
    # bf16 matmul operands + bf16 intermediate (f32 accumulation / f32 BN math)
    # -> slightly looser tolerance vs the f32 reference.
    np.testing.assert_allclose(np.asarray(out), np.asarray(ref),
                               rtol=2e-2, atol=2e-2)

    # tanh, no batchnorm: single fused conv+activation kernel, single-tile grid.
    out2 = jax.block_until_ready(
        fractionally_strided_conv_block(x, w, gamma, beta, activ='tanh',
                                        batchnorm=False,
                                        single_buffer_weight=sb))
    ref2 = _reference(x, w, gamma, beta, 'tanh', False)
    np.testing.assert_allclose(np.asarray(out2), np.asarray(ref2),
                               rtol=2e-2, atol=2e-2)

    print("KERNEL_OK")
</pallas_src>

<mosaic_0001>
module attributes {stable_mosaic.version = 11 : i64} {
  func.func @_conv_stats_kernel(%arg0: i32, %arg1: memref<32x48xbf16, #tpu.memory_space<vmem>>, %arg2: memref<48x256xbf16, #tpu.memory_space<vmem>>, %arg3: memref<32x256xbf16, #tpu.memory_space<vmem>>, %arg4: memref<1x32x1xf32, #tpu.memory_space<vmem>>, %arg5: memref<1x32x1xf32, #tpu.memory_space<vmem>>) attributes {dimension_semantics = [#tpu.dimension_semantics<parallel>], iteration_bounds = array<i64: 2>, scalar_prefetch = 0 : i64, scratch_operands = 0 : i64, tpu.core_type = #tpu.core_type<tc>, window_params = [{pipeline_mode = #tpu.pipeline_mode<synchronous>, transform_indices = @transform_0, window_bounds = array<i64: 32, 48>}, {transform_indices = @transform_1, window_bounds = array<i64: 48, 256>}, {transform_indices = @transform_2, window_bounds = array<i64: 32, 256>}, {transform_indices = @transform_3, window_bounds = array<i64: 1, 32, 1>}, {transform_indices = @transform_4, window_bounds = array<i64: 1, 32, 1>}]} {
    %c0 = arith.constant 0 : index
    %c0_0 = arith.constant 0 : index
    %0 = vector.load %arg1[%c0, %c0_0] : memref<32x48xbf16, #tpu.memory_space<vmem>>, vector<32x48xbf16>
    %c0_1 = arith.constant 0 : index
    %c0_2 = arith.constant 0 : index
    %1 = vector.load %arg2[%c0_1, %c0_2] : memref<48x256xbf16, #tpu.memory_space<vmem>>, vector<48x256xbf16>
    %cst = arith.constant dense<0.000000e+00> : vector<32x256xf32>
    %2 = tpu.matmul %0, %1, %cst {dimension_numbers = #tpu.dot_dimension_numbers<[1], [0], [0], [1], [0, 0, 1, 1], [], []>} : vector<32x48xbf16>, vector<48x256xbf16>, vector<32x256xf32> -> vector<32x256xf32>
    %cst_3 = arith.constant dense<0.000000e+00> : vector<32xf32>
    %3 = vector.multi_reduction <add>, %2, %cst_3 [1] : vector<32x256xf32> to vector<32xf32>
    %4 = vector.shape_cast %3 : vector<32xf32> to vector<32x1xf32>
    %c0_4 = arith.constant 0 : index
    %c0_5 = arith.constant 0 : index
    %c0_6 = arith.constant 0 : index
    %5 = vector.load %arg4[%c0_4, %c0_5, %c0_6] : memref<1x32x1xf32, #tpu.memory_space<vmem>>, vector<1x32x1xf32>
    %6 = vector.shape_cast %5 : vector<1x32x1xf32> to vector<32x1xf32>
    %7 = vector.shape_cast %4 : vector<32x1xf32> to vector<1x32x1xf32>
    tpu.vector_store %arg4[%c0_4, %c0_5, %c0_6], %7 {strides = array<i32>} : memref<1x32x1xf32, #tpu.memory_space<vmem>>, vector<1x32x1xf32>,
    %8 = arith.mulf %2, %2 : vector<32x256xf32>
    %cst_7 = arith.constant dense<0.000000e+00> : vector<32xf32>
    %9 = vector.multi_reduction <add>, %8, %cst_7 [1] : vector<32x256xf32> to vector<32xf32>
    %10 = vector.shape_cast %9 : vector<32xf32> to vector<32x1xf32>
    %c0_8 = arith.constant 0 : index
    %c0_9 = arith.constant 0 : index
    %c0_10 = arith.constant 0 : index
    %11 = vector.load %arg5[%c0_8, %c0_9, %c0_10] : memref<1x32x1xf32, #tpu.memory_space<vmem>>, vector<1x32x1xf32>
    %12 = vector.shape_cast %11 : vector<1x32x1xf32> to vector<32x1xf32>
    %13 = vector.shape_cast %10 : vector<32x1xf32> to vector<1x32x1xf32>
    tpu.vector_store %arg5[%c0_8, %c0_9, %c0_10], %13 {strides = array<i32>} : memref<1x32x1xf32, #tpu.memory_space<vmem>>, vector<1x32x1xf32>,
    %14 = arith.truncf %2 : vector<32x256xf32> to vector<32x256xbf16>
    %c0_11 = arith.constant 0 : index
    %c0_12 = arith.constant 0 : index
    %15 = vector.load %arg3[%c0_11, %c0_12] : memref<32x256xbf16, #tpu.memory_space<vmem>>, vector<32x256xbf16>
    tpu.vector_store %arg3[%c0_11, %c0_12], %14 {strides = array<i32>} : memref<32x256xbf16, #tpu.memory_space<vmem>>, vector<32x256xbf16>,
    return
  }
  func.func @transform_0(%arg0: i32) -> (i32, i32) {
    %c0_i32 = arith.constant 0 : i32
    %c0_i32_0 = arith.constant 0 : i32
    %c0_i32_1 = arith.constant 0 : i32
    return %c0_i32, %c0_i32_0 : i32, i32
  }
  func.func @transform_1(%arg0: i32) -> (i32, i32) {
    %c0_i32 = arith.constant 0 : i32
    %c0_i32_0 = arith.constant 0 : i32
    return %c0_i32, %arg0 : i32, i32
  }
  func.func @transform_2(%arg0: i32) -> (i32, i32) {
    %c0_i32 = arith.constant 0 : i32
    %c0_i32_0 = arith.constant 0 : i32
    return %c0_i32, %arg0 : i32, i32
  }
  func.func @transform_3(%arg0: i32) -> (i32, i32, i32) {
    %c0_i32 = arith.constant 0 : i32
    %c0_i32_0 = arith.constant 0 : i32
    %c0_i32_1 = arith.constant 0 : i32
    return %arg0, %c0_i32, %c0_i32_0 : i32, i32, i32
  }
  func.func @transform_4(%arg0: i32) -> (i32, i32, i32) {
    %c0_i32 = arith.constant 0 : i32
    %c0_i32_0 = arith.constant 0 : i32
    %c0_i32_1 = arith.constant 0 : i32
    return %arg0, %c0_i32, %c0_i32_0 : i32, i32, i32
  }
}

module attributes {stable_mosaic.version = 11 : i64} {
  func.func @_bn_act_kernel(%arg0: i32, %arg1: memref<32x1xf32, #tpu.memory_space<vmem>>, %arg2: memref<32x1xf32, #tpu.memory_space<vmem>>, %arg3: memref<32x512xbf16, #tpu.memory_space<vmem>>, %arg4: memref<32x512xf32, #tpu.memory_space<vmem>>) attributes {dimension_semantics = [#tpu.dimension_semantics<parallel>], iteration_bounds = array<i64: 1>, scalar_prefetch = 0 : i64, scratch_operands = 0 : i64, tpu.core_type = #tpu.core_type<tc>, window_params = [{pipeline_mode = #tpu.pipeline_mode<synchronous>, transform_indices = @transform_0, window_bounds = array<i64: 32, 1>}, {pipeline_mode = #tpu.pipeline_mode<synchronous>, transform_indices = @transform_1, window_bounds = array<i64: 32, 1>}, {transform_indices = @transform_2, window_bounds = array<i64: 32, 512>}, {transform_indices = @transform_3, window_bounds = array<i64: 32, 512>}]} {
    %c0 = arith.constant 0 : index
    %c0_0 = arith.constant 0 : index
    %0 = vector.load %arg3[%c0, %c0_0] : memref<32x512xbf16, #tpu.memory_space<vmem>>, vector<32x512xbf16>
    %1 = arith.extf %0 : vector<32x512xbf16> to vector<32x512xf32>
    %c0_1 = arith.constant 0 : index
    %c0_2 = arith.constant 0 : index
    %2 = vector.load %arg1[%c0_1, %c0_2] : memref<32x1xf32, #tpu.memory_space<vmem>>, vector<32x1xf32>
    %3 = vector.broadcast %2 : vector<32x1xf32> to vector<32x512xf32>
    %4 = arith.mulf %1, %3 : vector<32x512xf32>
    %c0_3 = arith.constant 0 : index
    %c0_4 = arith.constant 0 : index
    %5 = vector.load %arg2[%c0_3, %c0_4] : memref<32x1xf32, #tpu.memory_space<vmem>>, vector<32x1xf32>
    %6 = vector.broadcast %5 : vector<32x1xf32> to vector<32x512xf32>
    %7 = arith.addf %4, %6 : vector<32x512xf32>
    %cst = arith.constant 0.000000e+00 : f32
    %8 = vector.broadcast %cst : f32 to vector<32x512xf32>
    %9 = arith.maximumf %7, %8 : vector<32x512xf32>
    %c0_5 = arith.constant 0 : index
    %c0_6 = arith.constant 0 : index
    %10 = vector.load %arg4[%c0_5, %c0_6] : memref<32x512xf32, #tpu.memory_space<vmem>>, vector<32x512xf32>
    tpu.vector_store %arg4[%c0_5, %c0_6], %9 {strides = array<i32>} : memref<32x512xf32, #tpu.memory_space<vmem>>, vector<32x512xf32>,
    return
  }
  func.func @transform_0(%arg0: i32) -> (i32, i32) {
    %c0_i32 = arith.constant 0 : i32
    %c0_i32_0 = arith.constant 0 : i32
    %c0_i32_1 = arith.constant 0 : i32
    return %c0_i32, %c0_i32_0 : i32, i32
  }
  func.func @transform_1(%arg0: i32) -> (i32, i32) {
    %c0_i32 = arith.constant 0 : i32
    %c0_i32_0 = arith.constant 0 : i32
    %c0_i32_1 = arith.constant 0 : i32
    return %c0_i32, %c0_i32_0 : i32, i32
  }
  func.func @transform_2(%arg0: i32) -> (i32, i32) {
    %c0_i32 = arith.constant 0 : i32
    %c0_i32_0 = arith.constant 0 : i32
    return %c0_i32, %arg0 : i32, i32
  }
  func.func @transform_3(%arg0: i32) -> (i32, i32) {
    %c0_i32 = arith.constant 0 : i32
    %c0_i32_0 = arith.constant 0 : i32
    return %c0_i32, %arg0 : i32, i32
  }
}

module attributes {stable_mosaic.version = 11 : i64} {
  func.func @_conv_stats_kernel(%arg0: i32, %arg1: memref<32x48xbf16, #tpu.memory_space<vmem>>, %arg2: memref<48x256xbf16, #tpu.memory_space<vmem>>, %arg3: memref<32x256xbf16, #tpu.memory_space<vmem>>, %arg4: memref<1x32x1xf32, #tpu.memory_space<vmem>>, %arg5: memref<1x32x1xf32, #tpu.memory_space<vmem>>) attributes {dimension_semantics = [#tpu.dimension_semantics<parallel>], iteration_bounds = array<i64: 2>, scalar_prefetch = 0 : i64, scratch_operands = 0 : i64, tpu.core_type = #tpu.core_type<tc>, window_params = [{pipeline_mode = #tpu.pipeline_mode<synchronous>, transform_indices = @transform_0, window_bounds = array<i64: 32, 48>}, {transform_indices = @transform_1, window_bounds = array<i64: 48, 256>}, {transform_indices = @transform_2, window_bounds = array<i64: 32, 256>}, {transform_indices = @transform_3, window_bounds = array<i64: 1, 32, 1>}, {transform_indices = @transform_4, window_bounds = array<i64: 1, 32, 1>}]} {
    %c0 = arith.constant 0 : index
    %c0_0 = arith.constant 0 : index
    %0 = vector.load %arg1[%c0, %c0_0] : memref<32x48xbf16, #tpu.memory_space<vmem>>, vector<32x48xbf16>
    %c0_1 = arith.constant 0 : index
    %c0_2 = arith.constant 0 : index
    %1 = vector.load %arg2[%c0_1, %c0_2] : memref<48x256xbf16, #tpu.memory_space<vmem>>, vector<48x256xbf16>
    %cst = arith.constant dense<0.000000e+00> : vector<32x256xf32>
    %2 = tpu.matmul %0, %1, %cst {dimension_numbers = #tpu.dot_dimension_numbers<[1], [0], [0], [1], [0, 0, 1, 1], [], []>} : vector<32x48xbf16>, vector<48x256xbf16>, vector<32x256xf32> -> vector<32x256xf32>
    %cst_3 = arith.constant dense<0.000000e+00> : vector<32xf32>
    %3 = vector.multi_reduction <add>, %2, %cst_3 [1] : vector<32x256xf32> to vector<32xf32>
    %4 = vector.shape_cast %3 : vector<32xf32> to vector<32x1xf32>
    %c0_4 = arith.constant 0 : index
    %c0_5 = arith.constant 0 : index
    %c0_6 = arith.constant 0 : index
    %5 = vector.load %arg4[%c0_4, %c0_5, %c0_6] : memref<1x32x1xf32, #tpu.memory_space<vmem>>, vector<1x32x1xf32>
    %6 = vector.shape_cast %5 : vector<1x32x1xf32> to vector<32x1xf32>
    %7 = vector.shape_cast %4 : vector<32x1xf32> to vector<1x32x1xf32>
    tpu.vector_store %arg4[%c0_4, %c0_5, %c0_6], %7 {strides = array<i32>} : memref<1x32x1xf32, #tpu.memory_space<vmem>>, vector<1x32x1xf32>,
    %8 = arith.mulf %2, %2 : vector<32x256xf32>
    %cst_7 = arith.constant dense<0.000000e+00> : vector<32xf32>
    %9 = vector.multi_reduction <add>, %8, %cst_7 [1] : vector<32x256xf32> to vector<32xf32>
    %10 = vector.shape_cast %9 : vector<32xf32> to vector<32x1xf32>
    %c0_8 = arith.constant 0 : index
    %c0_9 = arith.constant 0 : index
    %c0_10 = arith.constant 0 : index
    %11 = vector.load %arg5[%c0_8, %c0_9, %c0_10] : memref<1x32x1xf32, #tpu.memory_space<vmem>>, vector<1x32x1xf32>
    %12 = vector.shape_cast %11 : vector<1x32x1xf32> to vector<32x1xf32>
    %13 = vector.shape_cast %10 : vector<32x1xf32> to vector<1x32x1xf32>
    tpu.vector_store %arg5[%c0_8, %c0_9, %c0_10], %13 {strides = array<i32>} : memref<1x32x1xf32, #tpu.memory_space<vmem>>, vector<1x32x1xf32>,
    %14 = arith.truncf %2 : vector<32x256xf32> to vector<32x256xbf16>
    %c0_11 = arith.constant 0 : index
    %c0_12 = arith.constant 0 : index
    %15 = vector.load %arg3[%c0_11, %c0_12] : memref<32x256xbf16, #tpu.memory_space<vmem>>, vector<32x256xbf16>
    tpu.vector_store %arg3[%c0_11, %c0_12], %14 {strides = array<i32>} : memref<32x256xbf16, #tpu.memory_space<vmem>>, vector<32x256xbf16>,
    return
  }
  func.func @transform_0(%arg0: i32) -> (i32, i32) {
    %c0_i32 = arith.constant 0 : i32
    %c0_i32_0 = arith.constant 0 : i32
    %c0_i32_1 = arith.constant 0 : i32
    return %c0_i32, %c0_i32_0 : i32, i32
  }
  func.func @transform_1(%arg0: i32) -> (i32, i32) {
    %c0_i32 = arith.constant 0 : i32
    %c0_i32_0 = arith.constant 0 : i32
    return %c0_i32, %arg0 : i32, i32
  }
  func.func @transform_2(%arg0: i32) -> (i32, i32) {
    %c0_i32 = arith.constant 0 : i32
    %c0_i32_0 = arith.constant 0 : i32
    return %c0_i32, %arg0 : i32, i32
  }
  func.func @transform_3(%arg0: i32) -> (i32, i32, i32) {
    %c0_i32 = arith.constant 0 : i32
    %c0_i32_0 = arith.constant 0 : i32
    %c0_i32_1 = arith.constant 0 : i32
    return %arg0, %c0_i32, %c0_i32_0 : i32, i32, i32
  }
  func.func @transform_4(%arg0: i32) -> (i32, i32, i32) {
    %c0_i32 = arith.constant 0 : i32
    %c0_i32_0 = arith.constant 0 : i32
    %c0_i32_1 = arith.constant 0 : i32
    return %arg0, %c0_i32, %c0_i32_0 : i32, i32, i32
  }
}

module attributes {stable_mosaic.version = 11 : i64} {
  func.func @_bn_act_kernel(%arg0: i32, %arg1: memref<32x1xf32, #tpu.memory_space<vmem>>, %arg2: memref<32x1xf32, #tpu.memory_space<vmem>>, %arg3: memref<32x512xbf16, #tpu.memory_space<vmem>>, %arg4: memref<32x512xf32, #tpu.memory_space<vmem>>) attributes {dimension_semantics = [#tpu.dimension_semantics<parallel>], iteration_bounds = array<i64: 1>, scalar_prefetch = 0 : i64, scratch_operands = 0 : i64, tpu.core_type = #tpu.core_type<tc>, window_params = [{pipeline_mode = #tpu.pipeline_mode<synchronous>, transform_indices = @transform_0, window_bounds = array<i64: 32, 1>}, {pipeline_mode = #tpu.pipeline_mode<synchronous>, transform_indices = @transform_1, window_bounds = array<i64: 32, 1>}, {transform_indices = @transform_2, window_bounds = array<i64: 32, 512>}, {transform_indices = @transform_3, window_bounds = array<i64: 32, 512>}]} {
    %c0 = arith.constant 0 : index
    %c0_0 = arith.constant 0 : index
    %0 = vector.load %arg3[%c0, %c0_0] : memref<32x512xbf16, #tpu.memory_space<vmem>>, vector<32x512xbf16>
    %1 = arith.extf %0 : vector<32x512xbf16> to vector<32x512xf32>
    %c0_1 = arith.constant 0 : index
    %c0_2 = arith.constant 0 : index
    %2 = vector.load %arg1[%c0_1, %c0_2] : memref<32x1xf32, #tpu.memory_space<vmem>>, vector<32x1xf32>
    %3 = vector.broadcast %2 : vector<32x1xf32> to vector<32x512xf32>
    %4 = arith.mulf %1, %3 : vector<32x512xf32>
    %c0_3 = arith.constant 0 : index
    %c0_4 = arith.constant 0 : index
    %5 = vector.load %arg2[%c0_3, %c0_4] : memref<32x1xf32, #tpu.memory_space<vmem>>, vector<32x1xf32>
    %6 = vector.broadcast %5 : vector<32x1xf32> to vector<32x512xf32>
    %7 = arith.addf %4, %6 : vector<32x512xf32>
    %cst = arith.constant 0.000000e+00 : f32
    %8 = vector.broadcast %cst : f32 to vector<32x512xf32>
    %9 = arith.maximumf %7, %8 : vector<32x512xf32>
    %c0_5 = arith.constant 0 : index
    %c0_6 = arith.constant 0 : index
    %10 = vector.load %arg4[%c0_5, %c0_6] : memref<32x512xf32, #tpu.memory_space<vmem>>, vector<32x512xf32>
    tpu.vector_store %arg4[%c0_5, %c0_6], %9 {strides = array<i32>} : memref<32x512xf32, #tpu.memory_space<vmem>>, vector<32x512xf32>,
    return
  }
  func.func @transform_0(%arg0: i32) -> (i32, i32) {
    %c0_i32 = arith.constant 0 : i32
    %c0_i32_0 = arith.constant 0 : i32
    %c0_i32_1 = arith.constant 0 : i32
    return %c0_i32, %c0_i32_0 : i32, i32
  }
  func.func @transform_1(%arg0: i32) -> (i32, i32) {
    %c0_i32 = arith.constant 0 : i32
    %c0_i32_0 = arith.constant 0 : i32
    %c0_i32_1 = arith.constant 0 : i32
    return %c0_i32, %c0_i32_0 : i32, i32
  }
  func.func @transform_2(%arg0: i32) -> (i32, i32) {
    %c0_i32 = arith.constant 0 : i32
    %c0_i32_0 = arith.constant 0 : i32
    return %c0_i32, %arg0 : i32, i32
  }
  func.func @transform_3(%arg0: i32) -> (i32, i32) {
    %c0_i32 = arith.constant 0 : i32
    %c0_i32_0 = arith.constant 0 : i32
    return %c0_i32, %arg0 : i32, i32
  }
}

</mosaic_0001>

<bundles_post_ra>
// kernel: tile.18
= control target key start
LH: loop header
LB: loop body
LE: loop exit
PB: predicated region body
PF: predicated region fallthrough
CT: control target
= control target key end

     0   :  { %s22_s0 = inlined_call_operand.vmem [shape: f32[8], index: 0, kind: input, shape index: {}]   ;;  %s23_s1 = inlined_call_operand.vmem [shape: f32[4,8], index: 1, kind: output, shape index: {}]  }
   0x1   :  { %v4_v0 = vld [vmem:[%s22_s0] ss:$0 sm:$0xff] }
   0x2   :  { %5 = vst [vmem:[%s23_s1] sm:$0xf] %v4_v0 }

// kernel: fractionally_strided_conv_block.3
= control target key start
LH: loop header
LB: loop body
LE: loop exit
PB: predicated region body
PF: predicated region fallthrough
CT: control target
= control target key end

     0   :  { %v158_v0 = vmov 0   ;;  %s281_s0 = inlined_call_operand.vmem [shape: f32[32,1], index: 0, kind: input, shape index: {}]   ;;  %s282_s1 = inlined_call_operand.vmem [shape: f32[32,1], index: 1, kind: input, shape index: {}]   ;;  %s283_s2 = inlined_call_operand.vmem [shape: bf16[32,512], index: 2, kind: input, shape index: {}]   ;;  %s284_s3 = inlined_call_operand.vmem [shape: f32[32,512], index: 3, kind: output, shape index: {}]  }
   0x1   :  { %156 = vset.pattern.permute.xlu1 %v158_v0  ;;  %155 = vset.pattern.permute.xlu0 %v158_v0  ;;  %v40_v1 = vld [vmem:[%s281_s0 + $0x10] sm:$0xff]  ;;  %v38_v2 = vld [vmem:[%s281_s0] sm:$0xff]  ;;  %v41_v4 = vld [vmem:[%s281_s0 + $0x18] sm:$0xff] }
   0x2   :  { %54 = vperm.xlu1 %156, %v40_v1   ;;  %44 = vperm.xlu0 %155, %v38_v2   ;;  %v78_v3 = vld [vmem:[%s282_s1] sm:$0xff]  ;;  %v39_v5 = vld [vmem:[%s281_s0 + $0x8] sm:$0xff]  ;;  %v81_v7 = vld [vmem:[%s282_s1 + $0x18] sm:$0xff] }
   0x3   :  { %157 = vset.pattern.permute.xlu2 %v158_v0  ;;  %v79_v6 = vld [vmem:[%s282_s1 + $0x8] sm:$0xff]  ;;  %v80_v8 = vld [vmem:[%s282_s1 + $0x10] sm:$0xff]  ;;  %v14_v9 = vld [vmem:[%s283_s2] sm:$0xff] }
   0x4   :  { %84 = vperm.xlu2 %157, %v78_v3   ;;  %v15_v10 = vld [vmem:[%s283_s2 + $0x8] sm:$0xff]  ;;  %v22_v11 = vunpack.c.l.bf16 %v14_v9  ;;  %v23_v12 = vunpack.c.h.bf16 %v14_v9  ;;  %v16_v22 = vld [vmem:[%s283_s2 + $0x10] sm:$0xff]  ;;  %v17_v23 = vld [vmem:[%s283_s2 + $0x18] sm:$0xff] }
   0x5   :  { %v24_v13 = vunpack.c.l.bf16 %v15_v10  ;;  %v25_v14 = vunpack.c.h.bf16 %v15_v10  ;;  %v26_v28 = vunpack.c.l.bf16 %v16_v22  ;;  %v27_v29 = vunpack.c.h.bf16 %v16_v22  ;;  %v20_v36 = vld [vmem:[%s283_s2 + $0x30] sm:$0xff]  ;;  %v21_v37 = vld [vmem:[%s283_s2 + $0x38] sm:$0xff]  ;;  %v18_v44 = vld [vmem:[%s283_s2 + $0x20] sm:$0xff] }
   0x6   :  { %v28_v30 = vunpack.c.l.bf16 %v17_v23  ;;  %v29_v34 = vunpack.c.h.bf16 %v17_v23  ;;  %v19_v45 = vld [vmem:[%s283_s2 + $0x28] sm:$0xff]  ;;  %v34_v47 = vunpack.c.l.bf16 %v20_v36  ;;  %v35_v48 = vunpack.c.h.bf16 %v20_v36 }
   0x7   :  { %v36_v49 = vunpack.c.l.bf16 %v21_v37  ;;  %v37_v50 = vunpack.c.h.bf16 %v21_v37  ;;  %v30_v55 = vunpack.c.l.bf16 %v18_v44  ;;  %v31_v56 = vunpack.c.h.bf16 %v18_v44 }
   0x8   :  { %v32_v57 = vunpack.c.l.bf16 %v19_v45  ;;  %v33_v62 = vunpack.c.h.bf16 %v19_v45 }
   0xa   :  { %59 = vperm.xlu1 %156, %v41_v4   ;;  %49 = vperm.xlu0 %155, %v39_v5  }
   0xc   :  { %89 = vperm.xlu2 %157, %v79_v6  }
  0x12   :  { %99 = vperm.xlu1 %156, %v81_v7   ;;  %94 = vperm.xlu0 %155, %v80_v8  }
  0x5e   :  { %v85_v15 = vpop.permute.xlu2 %84 }
  0x66   :  { %v90_v46 = vpop.permute.xlu2 %89 }
  0x74   :  { %v209_v16 = vpop.permute.xlu1 %54  ;;  %v45_v17 = vpop.permute.xlu0 %44 }
  0x75   :  { %v62_v18 = vmul.f32 %v45_v17, %v22_v11  ;;  %v63_v19 = vmul.f32 %v45_v17, %v23_v12  ;;  %v64_v20 = vmul.f32 %v45_v17, %v24_v13  ;;  %v65_v21 = vmul.f32 %v45_v17, %v25_v14 }
  0x76   :  { %v70_v4 = vmul.f32 %v209_v16, %v30_v55  ;;  %v71_v5 = vmul.f32 %v209_v16, %v31_v56  ;;  %v72_v6 = vmul.f32 %v209_v16, %v32_v57  ;;  %v73_v12 = vmul.f32 %v209_v16, %v33_v62 }
  0x77   :  { %v102_v24 = vadd.f32 %v85_v15, %v62_v18  ;;  %v103_v25 = vadd.f32 %v85_v15, %v63_v19  ;;  %v104_v26 = vadd.f32 %v85_v15, %v64_v20  ;;  %v105_v27 = vadd.f32 %v85_v15, %v65_v21 }
  0x79   :  { %v118_v31 = vmax.f32 %v102_v24, 0.0  ;;  %v119_v32 = vmax.f32 %v103_v25, 0.0  ;;  %v120_v33 = vmax.f32 %v104_v26, 0.0  ;;  %v121_v35 = vmax.f32 %v105_v27, 0.0 }
  0x7b   :  { %134 = vst [vmem:[%s284_s3] sm:$0xff] %v118_v31 }
  0x7c   :  { %135 = vst [vmem:[%s284_s3 + $0x8] sm:$0xff] %v119_v32  ;;  %v60_v38 = vpop.permute.xlu1 %59  ;;  %v50_v39 = vpop.permute.xlu0 %49 }
  0x7d   :  { %136 = vst [vmem:[%s284_s3 + $0x10] sm:$0xff] %v120_v33  ;;  %v66_v40 = vmul.f32 %v50_v39, %v26_v28  ;;  %v67_v41 = vmul.f32 %v50_v39, %v27_v29  ;;  %v68_v42 = vmul.f32 %v50_v39, %v28_v30  ;;  %v69_v43 = vmul.f32 %v50_v39, %v29_v34 }
  0x7e   :  { %137 = vst [vmem:[%s284_s3 + $0x18] sm:$0xff] %v121_v35  ;;  %v74_v63 = vmul.f32 %v60_v38, %v34_v47  ;;  %v75_v0 = vmul.f32 %v60_v38, %v35_v48  ;;  %v76_v1 = vmul.f32 %v60_v38, %v36_v49  ;;  %v77_v2 = vmul.f32 %v60_v38, %v37_v50 }
  0x7f   :  { %v106_v51 = vadd.f32 %v90_v46, %v66_v40  ;;  %v107_v52 = vadd.f32 %v90_v46, %v67_v41  ;;  %v108_v53 = vadd.f32 %v90_v46, %v68_v42  ;;  %v109_v54 = vadd.f32 %v90_v46, %v69_v43 }
  0x81   :  { %v122_v58 = vmax.f32 %v106_v51, 0.0  ;;  %v123_v59 = vmax.f32 %v107_v52, 0.0  ;;  %v124_v60 = vmax.f32 %v108_v53, 0.0  ;;  %v125_v61 = vmax.f32 %v109_v54, 0.0 }
  0x83   :  { %138 = vst [vmem:[%s284_s3 + $0x20] sm:$0xff] %v122_v58 }
  0x84   :  { %139 = vst [vmem:[%s284_s3 + $0x28] sm:$0xff] %v123_v59  ;;  %v100_v3 = vpop.permute.xlu1 %99  ;;  %v95_v7 = vpop.permute.xlu0 %94 }
  0x85   :  { %140 = vst [vmem:[%s284_s3 + $0x30] sm:$0xff] %v124_v60  ;;  %v114_v8 = vadd.f32 %v100_v3, %v74_v63  ;;  %v115_v9 = vadd.f32 %v100_v3, %v75_v0  ;;  %v116_v10 = vadd.f32 %v100_v3, %v76_v1  ;;  %v117_v11 = vadd.f32 %v100_v3, %v77_v2 }
  0x86   :  { %141 = vst [vmem:[%s284_s3 + $0x38] sm:$0xff] %v125_v61  ;;  %v110_v13 = vadd.f32 %v95_v7, %v70_v4  ;;  %v111_v14 = vadd.f32 %v95_v7, %v71_v5  ;;  %v112_v19 = vadd.f32 %v95_v7, %v72_v6  ;;  %v113_v21 = vadd.f32 %v95_v7, %v73_v12 }
  0x87   :  { %v130_v15 = vmax.f32 %v114_v8, 0.0  ;;  %v131_v17 = vmax.f32 %v115_v9, 0.0  ;;  %v132_v18 = vmax.f32 %v116_v10, 0.0  ;;  %v133_v20 = vmax.f32 %v117_v11, 0.0 }
  0x88   :  { %v126_v22 = vmax.f32 %v110_v13, 0.0  ;;  %v127_v23 = vmax.f32 %v111_v14, 0.0  ;;  %v128_v16 = vmax.f32 %v112_v19, 0.0  ;;  %v129_v24 = vmax.f32 %v113_v21, 0.0 }
  0x89   :  { %146 = vst [vmem:[%s284_s3 + $0x60] sm:$0xff] %v130_v15 }
  0x8a   :  { %147 = vst [vmem:[%s284_s3 + $0x68] sm:$0xff] %v131_v17 }
  0x8b   :  { %148 = vst [vmem:[%s284_s3 + $0x70] sm:$0xff] %v132_v18 }
  0x8c   :  { %149 = vst [vmem:[%s284_s3 + $0x78] sm:$0xff] %v133_v20 }
  0x8d   :  { %142 = vst [vmem:[%s284_s3 + $0x40] sm:$0xff] %v126_v22 }
  0x8e   :  { %143 = vst [vmem:[%s284_s3 + $0x48] sm:$0xff] %v127_v23 }
  0x8f   :  { %144 = vst [vmem:[%s284_s3 + $0x50] sm:$0xff] %v128_v16 }
  0x90   :  { %145 = vst [vmem:[%s284_s3 + $0x58] sm:$0xff] %v129_v24 }

// kernel: fractionally_strided_conv_block.2
= control target key start
LH: loop header
LB: loop body
LE: loop exit
PB: predicated region body
PF: predicated region fallthrough
CT: control target
= control target key end

     0   :  { %s743_s15 = smov 0   ;;  %s745_s16 = smov 0   ;;  %s839_s0 = inlined_call_operand.vmem [shape: bf16[32,48], index: 0, kind: input, shape index: {}]   ;;  %s840_s1 = inlined_call_operand.vmem [shape: bf16[48,512], index: 1, kind: input, shape index: {}]   ;;  %s841_s2 = inlined_call_operand.vmem [shape: bf16[32,512], index: 2, kind: output, shape index: {0}]   ;;  %s842_s3 = inlined_call_operand.vmem [shape: f32[2,32,1], index: 3, kind: output, shape index: {1}]   ;;  %s843_s4 = inlined_call_operand.vmem [shape: f32[2,32,1], index: 4, kind: output, shape index: {2}]  }
   0x1   :  { %s747_s17 = smov 0  }
   0x2 LB: > { %s759_s18 = sadd.s32 4294967295, %s716_s17   ;;  %s762_s19 = sadd.s32 1, %s716_s17   ;;  %s716_s17 = sphi %s747_s17, %s847_s17   ;;  %s712_s16 = sphi %s745_s16, %s846_s16   ;;  %s708_s15 = sphi %s743_s15, %s845_s15  }
   0x3   : > { %s40_s20 = ssub.s32 %s716_s17, %s762_s19  ;;  %s43_s21 = sadd.s32 1, %s712_s16 }
   0x4   : > { %p41_p0 = scmp.eq.s32.totalorder %s40_s20, 0  ;;  %p50_p1 = scmp.ne.s32.totalorder %s712_s16, %s708_s15 }
   0x5   : > { %p51_p2 = scmp.eq.s32.totalorder %s716_s17, 0  ;;  %p80_p3 = scmp.eq.s32.totalorder %s759_s18, 1 }
   0x6   : > { %s772_s22 = scalar_select %p41_p0, %s712_s16, %s43_s21  }
   0x7   : > { %p52_p4 = por %p51_p2, %p50_p1  ;;  %p774_p5 = por %p80_p3, %p50_p1 }
   0x8   : > { %p600_p6 = scmp.ge.s32.totalorder %s716_s17, 2 }
   0xa   : > { %157 = sbr.rel (%p600_p6) target bundleno = 25 (0x19), region = 20 }
   0xf   : > { %160 = sbr.rel (!%p52_p4) target bundleno = 25 (0x19), region = 24  ;;  %s162_s24 = sand.u32 (%p52_p4), 1, %s712_s16  }
  0x10   : > { %s650_s25 = sshll.u32 (%p52_p4), %s716_s17, 3  ;;  %s668_s26 = smul.u32 (%p52_p4), 48, %s162_s24 }
  0x11   : > { %s167_s29 = scalar_lea.vmem (%p52_p4), %s840_s1, %s650_s25 }
  0x12   : > { %v206_v0 = vld [vmem:[%s167_s29] sm:$0xff] (%p52_p4)  ;;  %v208_v1 = vld [vmem:[%s167_s29 + $0x10] sm:$0xff] (%p52_p4)  ;;  %s164_s30 = scalar_lea.vmem (%p52_p4), [#allocation2], %s668_s26 }
  0x13   : > { %v210_v2 = vld [vmem:[%s167_s29 + $0x20] sm:$0xff] (%p52_p4)  ;;  %207 = vst [vmem:[%s164_s30] sm:$0xff] (%p52_p4), %v206_v0  ;;  %v212_v3 = vld [vmem:[%s167_s29 + $0x30] sm:$0xff] (%p52_p4) }
  0x14   : > { %209 = vst [vmem:[%s164_s30 + $0x8] sm:$0xff] %v208_v1  ;;  %v214_v4 = vld [vmem:[%s167_s29 + $0x40] sm:$0xff]  ;;  %v216_v5 = vld [vmem:[%s167_s29 + $0x50] sm:$0xff] }
  0x15   : > { %211 = vst [vmem:[%s164_s30 + $0x10] sm:$0xff] %v210_v2 }
  0x16   : > { %213 = vst [vmem:[%s164_s30 + $0x18] sm:$0xff] %v212_v3 }
  0x17   : > { %215 = vst [vmem:[%s164_s30 + $0x20] sm:$0xff] %v214_v4 }
  0x18   : > { %217 = vst [vmem:[%s164_s30 + $0x28] sm:$0xff] %v216_v5 }
  0x19 PF: > { %p603_p7 = scmp.ge.s32.totalorder %s716_s17, 1  ;;  %p222_p8 = scmp.lt.s32.totalorder %s716_s17, 3 }
  0x1b   : > { %p223_p9 = pnand %p603_p7, %p222_p8 }
  0x1c   : > { %s229_s5 = sand.u32 (!%p223_p9), 1, %s708_s15   ;;  %p265_p10 = scmp.lt.s32.totalorder (!%p223_p9), %s759_s18, 1 }
  0x1d   : > { %226 = sbr.rel (%p223_p9) target bundleno = 316 (0x13c), region = 62  ;;  %s604_s12 = sshll.u32 (!%p223_p9), %s229_s5, 5 }
  0x1e   : > { %s669_s6 = smul.u32 (!%p223_p9), 48, %s229_s5  ;;  %s797_s13 = scalar_lea.vmem (!%p223_p9), [#allocation3], %s604_s12 }
  0x20   : > { %s231_s7 = scalar_lea.vmem (!%p223_p9), [#allocation2], %s669_s6 }
  0x22   : > { %v635_v6 = vld [vmem:[%s231_s7 + $0x20] sm:$0xf]  ;;  %v660_v7 = vld [vmem:[%s231_s7 + $0x24] sm:$0xf0]  ;;  %v659_v8 = vld [vmem:[%s231_s7 + $0x24] sm:$0xf] }
  0x23   : > { %v636_v9 = vor.u32 %v660_v7, %v635_v6  ;;  %v637_v10 = vld [vmem:[%s231_s7 + $0x28] sm:$0xf0]  ;;  %v627_v11 = vld [vmem:[%s231_s7 + $0x10] sm:$0xf]  ;;  %v658_v12 = vld [vmem:[%s231_s7 + $0x14] sm:$0xf0] }
  0x24   : > { %v640_v13 = vor.u32 %v659_v8, %v637_v10  ;;  %v657_v14 = vld [vmem:[%s231_s7 + $0x14] sm:$0xf]  ;;  %v629_v15 = vld [vmem:[%s231_s7 + $0x18] sm:$0xf0]  ;;  %v628_v16 = vor.u32 %v658_v12, %v627_v11  ;;  %v619_v18 = vld [vmem:[%s231_s7] sm:$0xf] }
  0x25   : > { %338 = vmatpush.bf16.msra.mxu0 %v636_v9  ;;  %662 = vmatpush.bf16.msra.mxu2 %v636_v9  ;;  %v632_v17 = vor.u32 %v657_v14, %v629_v15  ;;  %v656_v19 = vld [vmem:[%s231_s7 + $0x4] sm:$0xf0]  ;;  %v655_v20 = vld [vmem:[%s231_s7 + $0x4] sm:$0xf]  ;;  %v621_v21 = vld [vmem:[%s231_s7 + $0x8] sm:$0xf0] }
  0x26   : > { %357 = vmatpush.bf16.msra.mxu1 %v640_v13  ;;  %665 = vmatpush.bf16.msra.mxu3 %v640_v13  ;;  %v620_v22 = vor.u32 %v656_v19, %v619_v18  ;;  %v624_v23 = vor.u32 %v655_v20, %v621_v21  ;;  %v653_v24 = vld [vmem:[%s839_s0] sm:$0xff]  ;;  %v654_v25 = vld [vmem:[%s839_s0 + $0x8] sm:$0xff]  ;;  %vm326_vm0 = vcmask 392192   ;;  %s266_s14 = scalar_select %p265_p10, %s759_s18, 1  ;;  %vm383_vm1 = vcmask 7168  }
  0x27   : > { %s661_s27 = sshll.u32 (%p774_p5), %s759_s18, 3 }
  0x28   : > { %s651_s15 = sshll.u32 %s266_s14, 5  ;;  %s439_s30 = scalar_lea.vmem (%p774_p5), %s841_s2, %s661_s27 }
  0x29   : > { %339 = vmatpush.bf16.msra.mxu0 %v628_v16  ;;  %663 = vmatpush.bf16.msra.mxu2 %v628_v16  ;;  %s269_s21 = scalar_lea.vmem %s842_s3, %s651_s15  ;;  %s274_s26 = scalar_lea.vmem %s843_s4, %s651_s15 }
  0x2a   : > { %358 = vmatpush.bf16.msra.mxu1 %v632_v17  ;;  %666 = vmatpush.bf16.msra.mxu3 %v632_v17 }
  0x2d   : > { %340 = vmatpush.bf16.msra.mxu0 %v620_v22  ;;  %664 = vmatpush.bf16.msra.mxu2 %v620_v22 }
  0x2e   : > { %359 = vmatpush.bf16.msra.mxu1 %v624_v23  ;;  %667 = vmatpush.bf16.msra.mxu3 %v624_v23 }
  0x30   : > { %641 = vmatmul.msk.bf16.vlgmr.msra.gmra.mxu0 %vm326_vm0, %v653_v24  ;;  %642 = vmatmul.msk.bf16.vlgmr.msra.gmra.mxu2 %vm326_vm0, %v654_v25 }
  0x31   : > { %643 = vmatmul.msk.bf16.vlgmr.msra.gmra.mxu1 %vm326_vm0, %v653_v24  ;;  %644 = vmatmul.msk.bf16.vlgmr.msra.gmra.mxu3 %vm326_vm0, %v654_v25 }
  0xad   : > { %v342_v26 = vpop.f32.mrf.mxu0 }
  0xae   : > { %v361_v27 = vpop.f32.mrf.mxu1  ;;  %v388_v28 = vmul.f32 %v342_v26, %v342_v26 }
  0xaf   : > { %v412_v29 = vpack.c.bf16 %v361_v27, %v342_v26  ;;  %v371_v30 = vadd.f32 %v361_v27, %v342_v26  ;;  %v389_v31 = vmul.f32 %v361_v27, %v361_v27 }
  0xb1   : > { %416 = vst [vmem:[%s797_s13] sm:$0xff] %v412_v29  ;;  %372 = vadd.xlane.f32.xlu0 %v371_v30  ;;  %v396_v32 = vadd.f32 %v389_v31, %v388_v28 }
  0xb3   : > { %397 = vadd.xlane.f32.xlu2 %v396_v32  ;;  %v347_v33 = vpop.f32.mrf.mxu2 }
  0xb4   : > { %v366_v34 = vpop.f32.mrf.mxu3  ;;  %v392_v45 = vmul.f32 %v347_v33, %v347_v33 }
  0xb5   : > { %v414_v35 = vpack.c.bf16 %v366_v34, %v347_v33  ;;  %v344_v36 = vpop.f32.mrf.mxu0  ;;  %v377_v37 = vadd.f32 %v366_v34, %v347_v33  ;;  %v393_v46 = vmul.f32 %v366_v34, %v366_v34 }
  0xb6   : > { %v390_v38 = vmul.f32 %v344_v36, %v344_v36  ;;  %v363_v39 = vpop.f32.mrf.mxu1 }
  0xb7   : > { %418 = vst [vmem:[%s797_s13 + $0x10] sm:$0xff] %v414_v35  ;;  %v391_v40 = vmul.f32 %v363_v39, %v363_v39  ;;  %v413_v41 = vpack.c.bf16 %v363_v39, %v344_v36  ;;  %378 = vadd.xlane.f32.xlu1 %v377_v37  ;;  %v374_v42 = vadd.f32 %v363_v39, %v344_v36 }
  0xb8   : > { %v402_v50 = vadd.f32 %v393_v46, %v392_v45  ;;  %v474_v62 = vld [vmem:[%s797_s13] sm:$0xff] (%p774_p5) }
  0xb9   : > { %417 = vst [vmem:[%s797_s13 + $0x8] sm:$0xff] %v413_v41  ;;  %375 = vadd.xlane.f32.xlu0 %v374_v42  ;;  %v399_v43 = vadd.f32 %v391_v40, %v390_v38 }
  0xba   : > { %475 = vst [vmem:[%s439_s30] sm:$0xff] (%p774_p5), %v474_v62 }
  0xbb   : > { %400 = vadd.xlane.f32.xlu2 %v399_v43  ;;  %v349_v44 = vpop.f32.mrf.mxu2 }
  0xbc   : > { %v368_v47 = vpop.f32.mrf.mxu3  ;;  %v394_v51 = vmul.f32 %v349_v44, %v349_v44 }
  0xbd   : > { %v415_v48 = vpack.c.bf16 %v368_v47, %v349_v44  ;;  %v380_v49 = vadd.f32 %v368_v47, %v349_v44  ;;  %v395_v52 = vmul.f32 %v368_v47, %v368_v47 }
  0xbe   : > { %v478_v0 = vld [vmem:[%s797_s13 + $0x10] sm:$0xff] (%p774_p5) }
  0xbf   : > { %419 = vst [vmem:[%s797_s13 + $0x18] sm:$0xff] %v415_v48  ;;  %381 = vadd.xlane.f32.xlu1 %v380_v49  ;;  %v405_v53 = vadd.f32 %v395_v52, %v394_v51 }
  0xc0   : > { %v476_v63 = vld [vmem:[%s797_s13 + $0x8] sm:$0xff] (%p774_p5)  ;;  %479 = vst [vmem:[%s439_s30 + $0x20] sm:$0xff] (%p774_p5), %v478_v0 }
  0xc1   : > { %403 = vadd.xlane.f32.xlu0 %v402_v50  ;;  %477 = vst [vmem:[%s439_s30 + $0x10] sm:$0xff] (%p774_p5), %v476_v63 }
  0xc6   : > { %v480_v1 = vld [vmem:[%s797_s13 + $0x18] sm:$0xff] (%p774_p5) }
  0xc7   : > { %406 = vadd.xlane.f32.xlu1 %v405_v53  ;;  %481 = vst [vmem:[%s439_s30 + $0x30] sm:$0xff] (%p774_p5), %v480_v1 }
 0x124   : > { %v373_v54 = vpop.xlane.xlu0 %372 }
 0x125   : > { %384 = vst.msk [vmem:[%s269_s21] sm:$0xff] %vm383_vm1, %v373_v54 }
 0x126   : > { %v398_v55 = vpop.xlane.xlu2 %397 }
 0x127   : > { %408 = vst.msk [vmem:[%s274_s26] sm:$0xff] %vm383_vm1, %v398_v55 }
 0x12a   : > { %v379_v56 = vpop.xlane.xlu1 %378 }
 0x12b   : > { %386 = vst.msk [vmem:[%s269_s21 + $0x10] sm:$0xff] %vm383_vm1, %v379_v56 }
 0x12c   : > { %v376_v57 = vpop.xlane.xlu0 %375 }
 0x12d   : > { %385 = vst.msk [vmem:[%s269_s21 + $0x8] sm:$0xff] %vm383_vm1, %v376_v57 }
 0x12e   : > { %v401_v58 = vpop.xlane.xlu2 %400 }
 0x12f   : > { %409 = vst.msk [vmem:[%s274_s26 + $0x8] sm:$0xff] %vm383_vm1, %v401_v58 }
 0x132   : > { %v382_v59 = vpop.xlane.xlu1 %381 }
 0x133   : > { %387 = vst.msk [vmem:[%s269_s21 + $0x18] sm:$0xff] %vm383_vm1, %v382_v59 }
 0x134   : > { %v404_v60 = vpop.xlane.xlu0 %403 }
 0x135   : > { %410 = vst.msk [vmem:[%s274_s26 + $0x10] sm:$0xff] %vm383_vm1, %v404_v60 }
 0x137   : > { %436 = sbr.rel (!%p774_p5) target bundleno = 316 (0x13c), region = 70 }
 0x13a   : > { %v407_v61 = vpop.xlane.xlu1 %406 }
 0x13b   : > { %411 = vst.msk [vmem:[%s274_s26 + $0x18] sm:$0xff] %vm383_vm1, %v407_v61 }
 0x13c PF: > { %p12_p11 = scmp.ge.s32.totalorder %s762_s19, 4   ;;  %s845_s15 = smov %s712_s16 }
 0x13d   : > { %s846_s16 = smov %s772_s22  ;;  %s847_s17 = smov %s762_s19 }
 0x13e   :  { %14 = sbr.rel (!%p12_p11) target bundleno = 2 (0x2), region = 163 }

// kernel: tile.18
= control target key start
LH: loop header
LB: loop body
LE: loop exit
PB: predicated region body
PF: predicated region fallthrough
CT: control target
= control target key end

     0   :  { %s22_s0 = inlined_call_operand.vmem [shape: f32[8], index: 0, kind: input, shape index: {}]   ;;  %s23_s1 = inlined_call_operand.vmem [shape: f32[4,8], index: 1, kind: output, shape index: {}]  }
   0x1   :  { %v4_v0 = vld [vmem:[%s22_s0] ss:$0 sm:$0xff] }
   0x2   :  { %5 = vst [vmem:[%s23_s1] sm:$0xf] %v4_v0 }

// kernel: fractionally_strided_conv_block.2
= control target key start
LH: loop header
LB: loop body
LE: loop exit
PB: predicated region body
PF: predicated region fallthrough
CT: control target
= control target key end

     0   :  { %s743_s15 = smov 0   ;;  %s745_s16 = smov 0   ;;  %s839_s0 = inlined_call_operand.vmem [shape: bf16[32,48], index: 0, kind: input, shape index: {}]   ;;  %s840_s1 = inlined_call_operand.vmem [shape: bf16[48,512], index: 1, kind: input, shape index: {}]   ;;  %s841_s2 = inlined_call_operand.vmem [shape: bf16[32,512], index: 2, kind: output, shape index: {0}]   ;;  %s842_s3 = inlined_call_operand.vmem [shape: f32[2,32,1], index: 3, kind: output, shape index: {1}]   ;;  %s843_s4 = inlined_call_operand.vmem [shape: f32[2,32,1], index: 4, kind: output, shape index: {2}]  }
   0x1   :  { %s747_s17 = smov 0  }
   0x2 LB: > { %s759_s18 = sadd.s32 4294967295, %s716_s17   ;;  %s762_s19 = sadd.s32 1, %s716_s17   ;;  %s716_s17 = sphi %s747_s17, %s847_s17   ;;  %s712_s16 = sphi %s745_s16, %s846_s16   ;;  %s708_s15 = sphi %s743_s15, %s845_s15  }
   0x3   : > { %s40_s20 = ssub.s32 %s716_s17, %s762_s19  ;;  %s43_s21 = sadd.s32 1, %s712_s16 }
   0x4   : > { %p41_p0 = scmp.eq.s32.totalorder %s40_s20, 0  ;;  %p50_p1 = scmp.ne.s32.totalorder %s712_s16, %s708_s15 }
   0x5   : > { %p51_p2 = scmp.eq.s32.totalorder %s716_s17, 0  ;;  %p80_p3 = scmp.eq.s32.totalorder %s759_s18, 1 }
   0x6   : > { %s772_s22 = scalar_select %p41_p0, %s712_s16, %s43_s21  }
   0x7   : > { %p52_p4 = por %p51_p2, %p50_p1  ;;  %p774_p5 = por %p80_p3, %p50_p1 }
   0x8   : > { %p600_p6 = scmp.ge.s32.totalorder %s716_s17, 2 }
   0xa   : > { %157 = sbr.rel (%p600_p6) target bundleno = 25 (0x19), region = 20 }
   0xf   : > { %160 = sbr.rel (!%p52_p4) target bundleno = 25 (0x19), region = 24  ;;  %s162_s24 = sand.u32 (%p52_p4), 1, %s712_s16  }
  0x10   : > { %s650_s25 = sshll.u32 (%p52_p4), %s716_s17, 3  ;;  %s668_s26 = smul.u32 (%p52_p4), 48, %s162_s24 }
  0x11   : > { %s167_s29 = scalar_lea.vmem (%p52_p4), %s840_s1, %s650_s25 }
  0x12   : > { %v206_v0 = vld [vmem:[%s167_s29] sm:$0xff] (%p52_p4)  ;;  %v208_v1 = vld [vmem:[%s167_s29 + $0x10] sm:$0xff] (%p52_p4)  ;;  %s164_s30 = scalar_lea.vmem (%p52_p4), [#allocation2], %s668_s26 }
  0x13   : > { %v210_v2 = vld [vmem:[%s167_s29 + $0x20] sm:$0xff] (%p52_p4)  ;;  %207 = vst [vmem:[%s164_s30] sm:$0xff] (%p52_p4), %v206_v0  ;;  %v212_v3 = vld [vmem:[%s167_s29 + $0x30] sm:$0xff] (%p52_p4) }
  0x14   : > { %209 = vst [vmem:[%s164_s30 + $0x8] sm:$0xff] %v208_v1  ;;  %v214_v4 = vld [vmem:[%s167_s29 + $0x40] sm:$0xff]  ;;  %v216_v5 = vld [vmem:[%s167_s29 + $0x50] sm:$0xff] }
  0x15   : > { %211 = vst [vmem:[%s164_s30 + $0x10] sm:$0xff] %v210_v2 }
  0x16   : > { %213 = vst [vmem:[%s164_s30 + $0x18] sm:$0xff] %v212_v3 }
  0x17   : > { %215 = vst [vmem:[%s164_s30 + $0x20] sm:$0xff] %v214_v4 }
  0x18   : > { %217 = vst [vmem:[%s164_s30 + $0x28] sm:$0xff] %v216_v5 }
  0x19 PF: > { %p603_p7 = scmp.ge.s32.totalorder %s716_s17, 1  ;;  %p222_p8 = scmp.lt.s32.totalorder %s716_s17, 3 }
  0x1b   : > { %p223_p9 = pnand %p603_p7, %p222_p8 }
  0x1c   : > { %s229_s5 = sand.u32 (!%p223_p9), 1, %s708_s15   ;;  %p265_p10 = scmp.lt.s32.totalorder (!%p223_p9), %s759_s18, 1 }
  0x1d   : > { %226 = sbr.rel (%p223_p9) target bundleno = 316 (0x13c), region = 62  ;;  %s604_s12 = sshll.u32 (!%p223_p9), %s229_s5, 5 }
  0x1e   : > { %s669_s6 = smul.u32 (!%p223_p9), 48, %s229_s5  ;;  %s797_s13 = scalar_lea.vmem (!%p223_p9), [#allocation3], %s604_s12 }
  0x20   : > { %s231_s7 = scalar_lea.vmem (!%p223_p9), [#allocation2], %s669_s6 }
  0x22   : > { %v635_v6 = vld [vmem:[%s231_s7 + $0x20] sm:$0xf]  ;;  %v660_v7 = vld [vmem:[%s231_s7 + $0x24] sm:$0xf0]  ;;  %v659_v8 = vld [vmem:[%s231_s7 + $0x24] sm:$0xf] }
  0x23   : > { %v636_v9 = vor.u32 %v660_v7, %v635_v6  ;;  %v637_v10 = vld [vmem:[%s231_s7 + $0x28] sm:$0xf0]  ;;  %v627_v11 = vld [vmem:[%s231_s7 + $0x10] sm:$0xf]  ;;  %v658_v12 = vld [vmem:[%s231_s7 + $0x14] sm:$0xf0] }
  0x24   : > { %v640_v13 = vor.u32 %v659_v8, %v637_v10  ;;  %v657_v14 = vld [vmem:[%s231_s7 + $0x14] sm:$0xf]  ;;  %v629_v15 = vld [vmem:[%s231_s7 + $0x18] sm:$0xf0]  ;;  %v628_v16 = vor.u32 %v658_v12, %v627_v11  ;;  %v619_v18 = vld [vmem:[%s231_s7] sm:$0xf] }
  0x25   : > { %338 = vmatpush.bf16.msra.mxu0 %v636_v9  ;;  %662 = vmatpush.bf16.msra.mxu2 %v636_v9  ;;  %v632_v17 = vor.u32 %v657_v14, %v629_v15  ;;  %v656_v19 = vld [vmem:[%s231_s7 + $0x4] sm:$0xf0]  ;;  %v655_v20 = vld [vmem:[%s231_s7 + $0x4] sm:$0xf]  ;;  %v621_v21 = vld [vmem:[%s231_s7 + $0x8] sm:$0xf0] }
  0x26   : > { %357 = vmatpush.bf16.msra.mxu1 %v640_v13  ;;  %665 = vmatpush.bf16.msra.mxu3 %v640_v13  ;;  %v620_v22 = vor.u32 %v656_v19, %v619_v18  ;;  %v624_v23 = vor.u32 %v655_v20, %v621_v21  ;;  %v653_v24 = vld [vmem:[%s839_s0] sm:$0xff]  ;;  %v654_v25 = vld [vmem:[%s839_s0 + $0x8] sm:$0xff]  ;;  %vm326_vm0 = vcmask 392192   ;;  %s266_s14 = scalar_select %p265_p10, %s759_s18, 1  ;;  %vm383_vm1 = vcmask 7168  }
  0x27   : > { %s661_s27 = sshll.u32 (%p774_p5), %s759_s18, 3 }
  0x28   : > { %s651_s15 = sshll.u32 %s266_s14, 5  ;;  %s439_s30 = scalar_lea.vmem (%p774_p5), %s841_s2, %s661_s27 }
  0x29   : > { %339 = vmatpush.bf16.msra.mxu0 %v628_v16  ;;  %663 = vmatpush.bf16.msra.mxu2 %v628_v16  ;;  %s269_s21 = scalar_lea.vmem %s842_s3, %s651_s15  ;;  %s274_s26 = scalar_lea.vmem %s843_s4, %s651_s15 }
  0x2a   : > { %358 = vmatpush.bf16.msra.mxu1 %v632_v17  ;;  %666 = vmatpush.bf16.msra.mxu3 %v632_v17 }
  0x2d   : > { %340 = vmatpush.bf16.msra.mxu0 %v620_v22  ;;  %664 = vmatpush.bf16.msra.mxu2 %v620_v22 }
  0x2e   : > { %359 = vmatpush.bf16.msra.mxu1 %v624_v23  ;;  %667 = vmatpush.bf16.msra.mxu3 %v624_v23 }
  0x30   : > { %641 = vmatmul.msk.bf16.vlgmr.msra.gmra.mxu0 %vm326_vm0, %v653_v24  ;;  %642 = vmatmul.msk.bf16.vlgmr.msra.gmra.mxu2 %vm326_vm0, %v654_v25 }
  0x31   : > { %643 = vmatmul.msk.bf16.vlgmr.msra.gmra.mxu1 %vm326_vm0, %v653_v24  ;;  %644 = vmatmul.msk.bf16.vlgmr.msra.gmra.mxu3 %vm326_vm0, %v654_v25 }
  0xad   : > { %v342_v26 = vpop.f32.mrf.mxu0 }
  0xae   : > { %v361_v27 = vpop.f32.mrf.mxu1  ;;  %v388_v28 = vmul.f32 %v342_v26, %v342_v26 }
  0xaf   : > { %v412_v29 = vpack.c.bf16 %v361_v27, %v342_v26  ;;  %v371_v30 = vadd.f32 %v361_v27, %v342_v26  ;;  %v389_v31 = vmul.f32 %v361_v27, %v361_v27 }
  0xb1   : > { %416 = vst [vmem:[%s797_s13] sm:$0xff] %v412_v29  ;;  %372 = vadd.xlane.f32.xlu0 %v371_v30  ;;  %v396_v32 = vadd.f32 %v389_v31, %v388_v28 }
  0xb3   : > { %397 = vadd.xlane.f32.xlu2 %v396_v32  ;;  %v347_v33 = vpop.f32.mrf.mxu2 }
  0xb4   : > { %v366_v34 = vpop.f32.mrf.mxu3  ;;  %v392_v45 = vmul.f32 %v347_v33, %v347_v33 }
  0xb5   : > { %v414_v35 = vpack.c.bf16 %v366_v34, %v347_v33  ;;  %v344_v36 = vpop.f32.mrf.mxu0  ;;  %v377_v37 = vadd.f32 %v366_v34, %v347_v33  ;;  %v393_v46 = vmul.f32 %v366_v34, %v366_v34 }
  0xb6   : > { %v390_v38 = vmul.f32 %v344_v36, %v344_v36  ;;  %v363_v39 = vpop.f32.mrf.mxu1 }
  0xb7   : > { %418 = vst [vmem:[%s797_s13 + $0x10] sm:$0xff] %v414_v35  ;;  %v391_v40 = vmul.f32 %v363_v39, %v363_v39  ;;  %v413_v41 = vpack.c.bf16 %v363_v39, %v344_v36  ;;  %378 = vadd.xlane.f32.xlu1 %v377_v37  ;;  %v374_v42 = vadd.f32 %v363_v39, %v344_v36 }
  0xb8   : > { %v402_v50 = vadd.f32 %v393_v46, %v392_v45  ;;  %v474_v62 = vld [vmem:[%s797_s13] sm:$0xff] (%p774_p5) }
  0xb9   : > { %417 = vst [vmem:[%s797_s13 + $0x8] sm:$0xff] %v413_v41  ;;  %375 = vadd.xlane.f32.xlu0 %v374_v42  ;;  %v399_v43 = vadd.f32 %v391_v40, %v390_v38 }
  0xba   : > { %475 = vst [vmem:[%s439_s30] sm:$0xff] (%p774_p5), %v474_v62 }
  0xbb   : > { %400 = vadd.xlane.f32.xlu2 %v399_v43  ;;  %v349_v44 = vpop.f32.mrf.mxu2 }
  0xbc   : > { %v368_v47 = vpop.f32.mrf.mxu3  ;;  %v394_v51 = vmul.f32 %v349_v44, %v349_v44 }
  0xbd   : > { %v415_v48 = vpack.c.bf16 %v368_v47, %v349_v44  ;;  %v380_v49 = vadd.f32 %v368_v47, %v349_v44  ;;  %v395_v52 = vmul.f32 %v368_v47, %v368_v47 }
  0xbe   : > { %v478_v0 = vld [vmem:[%s797_s13 + $0x10] sm:$0xff] (%p774_p5) }
  0xbf   : > { %419 = vst [vmem:[%s797_s13 + $0x18] sm:$0xff] %v415_v48  ;;  %381 = vadd.xlane.f32.xlu1 %v380_v49  ;;  %v405_v53 = vadd.f32 %v395_v52, %v394_v51 }
  0xc0   : > { %v476_v63 = vld [vmem:[%s797_s13 + $0x8] sm:$0xff] (%p774_p5)  ;;  %479 = vst [vmem:[%s439_s30 + $0x20] sm:$0xff] (%p774_p5), %v478_v0 }
  0xc1   : > { %403 = vadd.xlane.f32.xlu0 %v402_v50  ;;  %477 = vst [vmem:[%s439_s30 + $0x10] sm:$0xff] (%p774_p5), %v476_v63 }
  0xc6   : > { %v480_v1 = vld [vmem:[%s797_s13 + $0x18] sm:$0xff] (%p774_p5) }
  0xc7   : > { %406 = vadd.xlane.f32.xlu1 %v405_v53  ;;  %481 = vst [vmem:[%s439_s30 + $0x30] sm:$0xff] (%p774_p5), %v480_v1 }
 0x124   : > { %v373_v54 = vpop.xlane.xlu0 %372 }
 0x125   : > { %384 = vst.msk [vmem:[%s269_s21] sm:$0xff] %vm383_vm1, %v373_v54 }
 0x126   : > { %v398_v55 = vpop.xlane.xlu2 %397 }
 0x127   : > { %408 = vst.msk [vmem:[%s274_s26] sm:$0xff] %vm383_vm1, %v398_v55 }
 0x12a   : > { %v379_v56 = vpop.xlane.xlu1 %378 }
 0x12b   : > { %386 = vst.msk [vmem:[%s269_s21 + $0x10] sm:$0xff] %vm383_vm1, %v379_v56 }
 0x12c   : > { %v376_v57 = vpop.xlane.xlu0 %375 }
 0x12d   : > { %385 = vst.msk [vmem:[%s269_s21 + $0x8] sm:$0xff] %vm383_vm1, %v376_v57 }
 0x12e   : > { %v401_v58 = vpop.xlane.xlu2 %400 }
 0x12f   : > { %409 = vst.msk [vmem:[%s274_s26 + $0x8] sm:$0xff] %vm383_vm1, %v401_v58 }
 0x132   : > { %v382_v59 = vpop.xlane.xlu1 %381 }
 0x133   : > { %387 = vst.msk [vmem:[%s269_s21 + $0x18] sm:$0xff] %vm383_vm1, %v382_v59 }
 0x134   : > { %v404_v60 = vpop.xlane.xlu0 %403 }
 0x135   : > { %410 = vst.msk [vmem:[%s274_s26 + $0x10] sm:$0xff] %vm383_vm1, %v404_v60 }
 0x137   : > { %436 = sbr.rel (!%p774_p5) target bundleno = 316 (0x13c), region = 70 }
 0x13a   : > { %v407_v61 = vpop.xlane.xlu1 %406 }
 0x13b   : > { %411 = vst.msk [vmem:[%s274_s26 + $0x18] sm:$0xff] %vm383_vm1, %v407_v61 }
 0x13c PF: > { %p12_p11 = scmp.ge.s32.totalorder %s762_s19, 4   ;;  %s845_s15 = smov %s712_s16 }
 0x13d   : > { %s846_s16 = smov %s772_s22  ;;  %s847_s17 = smov %s762_s19 }
 0x13e   :  { %14 = sbr.rel (!%p12_p11) target bundleno = 2 (0x2), region = 163 }

// kernel: fractionally_strided_conv_block.3
= control target key start
LH: loop header
LB: loop body
LE: loop exit
PB: predicated region body
PF: predicated region fallthrough
CT: control target
= control target key end

     0   :  { %v158_v0 = vmov 0   ;;  %s281_s0 = inlined_call_operand.vmem [shape: f32[32,1], index: 0, kind: input, shape index: {}]   ;;  %s282_s1 = inlined_call_operand.vmem [shape: f32[32,1], index: 1, kind: input, shape index: {}]   ;;  %s283_s2 = inlined_call_operand.vmem [shape: bf16[32,512], index: 2, kind: input, shape index: {}]   ;;  %s284_s3 = inlined_call_operand.vmem [shape: f32[32,512], index: 3, kind: output, shape index: {}]  }
   0x1   :  { %156 = vset.pattern.permute.xlu1 %v158_v0  ;;  %155 = vset.pattern.permute.xlu0 %v158_v0  ;;  %v40_v1 = vld [vmem:[%s281_s0 + $0x10] sm:$0xff]  ;;  %v38_v2 = vld [vmem:[%s281_s0] sm:$0xff]  ;;  %v41_v4 = vld [vmem:[%s281_s0 + $0x18] sm:$0xff] }
   0x2   :  { %54 = vperm.xlu1 %156, %v40_v1   ;;  %44 = vperm.xlu0 %155, %v38_v2   ;;  %v78_v3 = vld [vmem:[%s282_s1] sm:$0xff]  ;;  %v39_v5 = vld [vmem:[%s281_s0 + $0x8] sm:$0xff]  ;;  %v81_v7 = vld [vmem:[%s282_s1 + $0x18] sm:$0xff] }
   0x3   :  { %157 = vset.pattern.permute.xlu2 %v158_v0  ;;  %v79_v6 = vld [vmem:[%s282_s1 + $0x8] sm:$0xff]  ;;  %v80_v8 = vld [vmem:[%s282_s1 + $0x10] sm:$0xff]  ;;  %v14_v9 = vld [vmem:[%s283_s2] sm:$0xff] }
   0x4   :  { %84 = vperm.xlu2 %157, %v78_v3   ;;  %v15_v10 = vld [vmem:[%s283_s2 + $0x8] sm:$0xff]  ;;  %v22_v11 = vunpack.c.l.bf16 %v14_v9  ;;  %v23_v12 = vunpack.c.h.bf16 %v14_v9  ;;  %v16_v22 = vld [vmem:[%s283_s2 + $0x10] sm:$0xff]  ;;  %v17_v23 = vld [vmem:[%s283_s2 + $0x18] sm:$0xff] }
   0x5   :  { %v24_v13 = vunpack.c.l.bf16 %v15_v10  ;;  %v25_v14 = vunpack.c.h.bf16 %v15_v10  ;;  %v26_v28 = vunpack.c.l.bf16 %v16_v22  ;;  %v27_v29 = vunpack.c.h.bf16 %v16_v22  ;;  %v20_v36 = vld [vmem:[%s283_s2 + $0x30] sm:$0xff]  ;;  %v21_v37 = vld [vmem:[%s283_s2 + $0x38] sm:$0xff]  ;;  %v18_v44 = vld [vmem:[%s283_s2 + $0x20] sm:$0xff] }
   0x6   :  { %v28_v30 = vunpack.c.l.bf16 %v17_v23  ;;  %v29_v34 = vunpack.c.h.bf16 %v17_v23  ;;  %v19_v45 = vld [vmem:[%s283_s2 + $0x28] sm:$0xff]  ;;  %v34_v47 = vunpack.c.l.bf16 %v20_v36  ;;  %v35_v48 = vunpack.c.h.bf16 %v20_v36 }
   0x7   :  { %v36_v49 = vunpack.c.l.bf16 %v21_v37  ;;  %v37_v50 = vunpack.c.h.bf16 %v21_v37  ;;  %v30_v55 = vunpack.c.l.bf16 %v18_v44  ;;  %v31_v56 = vunpack.c.h.bf16 %v18_v44 }
   0x8   :  { %v32_v57 = vunpack.c.l.bf16 %v19_v45  ;;  %v33_v62 = vunpack.c.h.bf16 %v19_v45 }
   0xa   :  { %59 = vperm.xlu1 %156, %v41_v4   ;;  %49 = vperm.xlu0 %155, %v39_v5  }
   0xc   :  { %89 = vperm.xlu2 %157, %v79_v6  }
  0x12   :  { %99 = vperm.xlu1 %156, %v81_v7   ;;  %94 = vperm.xlu0 %155, %v80_v8  }
  0x5e   :  { %v85_v15 = vpop.permute.xlu2 %84 }
  0x66   :  { %v90_v46 = vpop.permute.xlu2 %89 }
  0x74   :  { %v209_v16 = vpop.permute.xlu1 %54  ;;  %v45_v17 = vpop.permute.xlu0 %44 }
  0x75   :  { %v62_v18 = vmul.f32 %v45_v17, %v22_v11  ;;  %v63_v19 = vmul.f32 %v45_v17, %v23_v12  ;;  %v64_v20 = vmul.f32 %v45_v17, %v24_v13  ;;  %v65_v21 = vmul.f32 %v45_v17, %v25_v14 }
  0x76   :  { %v70_v4 = vmul.f32 %v209_v16, %v30_v55  ;;  %v71_v5 = vmul.f32 %v209_v16, %v31_v56  ;;  %v72_v6 = vmul.f32 %v209_v16, %v32_v57  ;;  %v73_v12 = vmul.f32 %v209_v16, %v33_v62 }
  0x77   :  { %v102_v24 = vadd.f32 %v85_v15, %v62_v18  ;;  %v103_v25 = vadd.f32 %v85_v15, %v63_v19  ;;  %v104_v26 = vadd.f32 %v85_v15, %v64_v20  ;;  %v105_v27 = vadd.f32 %v85_v15, %v65_v21 }
  0x79   :  { %v118_v31 = vmax.f32 %v102_v24, 0.0  ;;  %v119_v32 = vmax.f32 %v103_v25, 0.0  ;;  %v120_v33 = vmax.f32 %v104_v26, 0.0  ;;  %v121_v35 = vmax.f32 %v105_v27, 0.0 }
  0x7b   :  { %134 = vst [vmem:[%s284_s3] sm:$0xff] %v118_v31 }
  0x7c   :  { %135 = vst [vmem:[%s284_s3 + $0x8] sm:$0xff] %v119_v32  ;;  %v60_v38 = vpop.permute.xlu1 %59  ;;  %v50_v39 = vpop.permute.xlu0 %49 }
  0x7d   :  { %136 = vst [vmem:[%s284_s3 + $0x10] sm:$0xff] %v120_v33  ;;  %v66_v40 = vmul.f32 %v50_v39, %v26_v28  ;;  %v67_v41 = vmul.f32 %v50_v39, %v27_v29  ;;  %v68_v42 = vmul.f32 %v50_v39, %v28_v30  ;;  %v69_v43 = vmul.f32 %v50_v39, %v29_v34 }
  0x7e   :  { %137 = vst [vmem:[%s284_s3 + $0x18] sm:$0xff] %v121_v35  ;;  %v74_v63 = vmul.f32 %v60_v38, %v34_v47  ;;  %v75_v0 = vmul.f32 %v60_v38, %v35_v48  ;;  %v76_v1 = vmul.f32 %v60_v38, %v36_v49  ;;  %v77_v2 = vmul.f32 %v60_v38, %v37_v50 }
  0x7f   :  { %v106_v51 = vadd.f32 %v90_v46, %v66_v40  ;;  %v107_v52 = vadd.f32 %v90_v46, %v67_v41  ;;  %v108_v53 = vadd.f32 %v90_v46, %v68_v42  ;;  %v109_v54 = vadd.f32 %v90_v46, %v69_v43 }
  0x81   :  { %v122_v58 = vmax.f32 %v106_v51, 0.0  ;;  %v123_v59 = vmax.f32 %v107_v52, 0.0  ;;  %v124_v60 = vmax.f32 %v108_v53, 0.0  ;;  %v125_v61 = vmax.f32 %v109_v54, 0.0 }
  0x83   :  { %138 = vst [vmem:[%s284_s3 + $0x20] sm:$0xff] %v122_v58 }
  0x84   :  { %139 = vst [vmem:[%s284_s3 + $0x28] sm:$0xff] %v123_v59  ;;  %v100_v3 = vpop.permute.xlu1 %99  ;;  %v95_v7 = vpop.permute.xlu0 %94 }
  0x85   :  { %140 = vst [vmem:[%s284_s3 + $0x30] sm:$0xff] %v124_v60  ;;  %v114_v8 = vadd.f32 %v100_v3, %v74_v63  ;;  %v115_v9 = vadd.f32 %v100_v3, %v75_v0  ;;  %v116_v10 = vadd.f32 %v100_v3, %v76_v1  ;;  %v117_v11 = vadd.f32 %v100_v3, %v77_v2 }
  0x86   :  { %141 = vst [vmem:[%s284_s3 + $0x38] sm:$0xff] %v125_v61  ;;  %v110_v13 = vadd.f32 %v95_v7, %v70_v4  ;;  %v111_v14 = vadd.f32 %v95_v7, %v71_v5  ;;  %v112_v19 = vadd.f32 %v95_v7, %v72_v6  ;;  %v113_v21 = vadd.f32 %v95_v7, %v73_v12 }
  0x87   :  { %v130_v15 = vmax.f32 %v114_v8, 0.0  ;;  %v131_v17 = vmax.f32 %v115_v9, 0.0  ;;  %v132_v18 = vmax.f32 %v116_v10, 0.0  ;;  %v133_v20 = vmax.f32 %v117_v11, 0.0 }
  0x88   :  { %v126_v22 = vmax.f32 %v110_v13, 0.0  ;;  %v127_v23 = vmax.f32 %v111_v14, 0.0  ;;  %v128_v16 = vmax.f32 %v112_v19, 0.0  ;;  %v129_v24 = vmax.f32 %v113_v21, 0.0 }
  0x89   :  { %146 = vst [vmem:[%s284_s3 + $0x60] sm:$0xff] %v130_v15 }
  0x8a   :  { %147 = vst [vmem:[%s284_s3 + $0x68] sm:$0xff] %v131_v17 }
  0x8b   :  { %148 = vst [vmem:[%s284_s3 + $0x70] sm:$0xff] %v132_v18 }
  0x8c   :  { %149 = vst [vmem:[%s284_s3 + $0x78] sm:$0xff] %v133_v20 }
  0x8d   :  { %142 = vst [vmem:[%s284_s3 + $0x40] sm:$0xff] %v126_v22 }
  0x8e   :  { %143 = vst [vmem:[%s284_s3 + $0x48] sm:$0xff] %v127_v23 }
  0x8f   :  { %144 = vst [vmem:[%s284_s3 + $0x50] sm:$0xff] %v128_v16 }
  0x90   :  { %145 = vst [vmem:[%s284_s3 + $0x58] sm:$0xff] %v129_v24 }

</bundles_post_ra>
